<compile_context>
chip_gen: v6e
topology: v6e:2x2x1
jax: 0.10.0
libtpu: 0.0.40
codegen_flags: <defaults>
</compile_context>

<pallas_src>
from functools import partial

import jax
import jax.numpy as jnp
from jax import lax
from jax.experimental import pallas as pl
from jax.experimental.pallas import tpu as pltpu


def _rmsnorm_kernel(x_ref, g_ref, o_ref, *, eps2):
    # x_ref: (TB, C, TS)   g_ref: (1, C, 1) -- already scaled by sqrt(C)
    xf = x_ref[...].astype(jnp.float32)
    g = g_ref[...].astype(jnp.float32)
    ss = jnp.sum(xf * xf, axis=1, keepdims=True)       # (TB, 1, TS)
    inv = lax.rsqrt(jnp.maximum(ss, eps2))              # EUP rsqrt, no divide
    o_ref[...] = (xf * inv * g).astype(o_ref.dtype)


def _round_up(x, m):
    return ((x + m - 1) // m) * m


def _vmem_capacity_bytes():
    """Per-core VMEM capacity; conservative 64 MiB fallback (v7x per-TC)."""
    try:
        cap = int(pltpu.get_tpu_info().vmem_capacity_bytes)
        if cap > 0:
            return cap
    except Exception:
        pass
    return 64 * 1024 * 1024


def _choose_tiles(B, C, S, itemsize, budget_bytes):
    """Pick (TB, TS) so one block is ~budget_bytes of PADDED VMEM data."""
    sub = max(8, 32 // itemsize)                # sublane packing: f32=8, bf16=16
    padded_c = _round_up(C, sub)
    col_bytes = padded_c * itemsize             # padded bytes per lane, per image

    # Spatial (lane) tile: multiple of 128, sized to the budget for TB = 1.
    max_lanes = max(128, (budget_bytes // col_bytes) // 128 * 128)
    if S <= max_lanes:
        TS = S                                  # full extent is always legal
    else:
        TS = max_lanes
        # Prefer a tile that divides S evenly (keeps all stores lane-dense).
        for cand in range(TS, 127, -128):
            if S % cand == 0:
                TS = cand
                break

    # Batch tile: grow the block when one (1, C, TS) slab is far below budget.
    per_b_bytes = col_bytes * _round_up(TS, 128)
    TB = max(1, min(B, budget_bytes // max(per_b_bytes, 1)))
    while TB > 1 and B % TB != 0:               # prefer an even split of B
        TB -= 1

    # Guarantee >= 2 grid steps so v7x megacore can shard across its 2 TCs.
    if pl.cdiv(B, TB) * pl.cdiv(S, TS) < 2:
        if B >= 2:
            TB = max(1, B // 2)
        elif TS >= 256:
            TS = _round_up(TS // 2, 128)

    return TB, TS, padded_c


def rmsnorm(x, g, eps=1e-12):
    """x: (B, C, H, W) NCHW, g: (1, C, 1, 1).  Returns (B, C, H, W)."""
    B, C, H, W = x.shape
    S = H * W
    xr = x.reshape(B, C, S)
    # Fold sqrt(dim) into g on the host (tiny one-time op on the parameter).
    gr = g.reshape(1, C, 1).astype(jnp.float32) * (float(C) ** 0.5)

    itemsize = jnp.dtype(x.dtype).itemsize
    vmem_cap = _vmem_capacity_bytes()
    # ~4 MiB blocks; shrink if the chip's VMEM is small (keeps 2*in + 2*out
    # comfortably inside scoped VMEM on every generation).
    budget_bytes = max(1 << 20, min(4 << 20, vmem_cap // 16))

    TB, TS, padded_c = _choose_tiles(B, C, S, itemsize, budget_bytes)
    n_b = pl.cdiv(B, TB)
    n_s = pl.cdiv(S, TS)

    # VMEM limit budgeted against the PADDED block (sublane-rounded C,
    # lane-rounded TS), double-buffered input + output, plus slack.
    block_bytes = TB * padded_c * _round_up(TS, 128) * itemsize
    vmem_limit = int(min(vmem_cap * 3 // 4,
                         max(4 * block_bytes + (4 << 20), 32 << 20)))

    eps2 = float(eps) * float(eps)              # clamp on sum-of-squares

    out = pl.pallas_call(
        partial(_rmsnorm_kernel, eps2=eps2),
        out_shape=jax.ShapeDtypeStruct((B, C, S), x.dtype),
        grid=(n_b, n_s),
        in_specs=[
            pl.BlockSpec((TB, C, TS), lambda b, s: (b, 0, s)),
            pl.BlockSpec((1, C, 1), lambda b, s: (0, 0, 0)),
        ],
        out_specs=pl.BlockSpec((TB, C, TS), lambda b, s: (b, 0, s)),
        compiler_params=pltpu.CompilerParams(
            dimension_semantics=("parallel", "parallel"),
            vmem_limit_bytes=vmem_limit,
        ),
    )(xr, gr)
    return out.reshape(B, C, H, W)


def rmsnorm_ref(x, g):
    # Pure-JAX reference mirroring F.normalize(x, dim=1) * g * sqrt(dim)
    C = x.shape[1]
    norm = jnp.sqrt(jnp.sum(x * x, axis=1, keepdims=True))
    norm = jnp.maximum(norm, 1e-12)
    return (x / norm) * g * (C ** 0.5)


if __name__ == "__main__":
    key = jax.random.PRNGKey(0)
    kx, _ = jax.random.split(key)

    B, C, H, W = 2, 4, 16, 16
    x = jax.random.normal(kx, (B, C, H, W), dtype=jnp.float32)
    # Parameter initialized deterministically as in the module (__init__: ones)
    g = jnp.ones((1, C, 1, 1), dtype=jnp.float32)

    out = rmsnorm(x, g)
    jax.block_until_ready(out)

    ref = rmsnorm_ref(x, g)
    assert out.shape == (B, C, H, W)
    assert jnp.allclose(out, ref, atol=1e-5, rtol=1e-5)

    print("KERNEL_OK")
</pallas_src>

<mosaic_0001>
module attributes {stable_mosaic.version = 11 : i64} {
  func.func @_rmsnorm_kernel(%arg0: i32, %arg1: i32, %arg2: memref<1x4x256xf32, #tpu.memory_space<vmem>>, %arg3: memref<1x4x1xf32, #tpu.memory_space<vmem>>, %arg4: memref<1x4x256xf32, #tpu.memory_space<vmem>>) attributes {dimension_semantics = [#tpu.dimension_semantics<parallel>, #tpu.dimension_semantics<parallel>], iteration_bounds = array<i64: 2, 1>, scalar_prefetch = 0 : i64, scratch_operands = 0 : i64, tpu.core_type = #tpu.core_type<tc>, window_params = [{transform_indices = @transform_0, window_bounds = array<i64: 1, 4, 256>}, {pipeline_mode = #tpu.pipeline_mode<synchronous>, transform_indices = @transform_1, window_bounds = array<i64: 1, 4, 1>}, {transform_indices = @transform_2, window_bounds = array<i64: 1, 4, 256>}]} {
    %c0 = arith.constant 0 : index
    %c0_0 = arith.constant 0 : index
    %c0_1 = arith.constant 0 : index
    %0 = vector.load %arg2[%c0, %c0_0, %c0_1] : memref<1x4x256xf32, #tpu.memory_space<vmem>>, vector<1x4x256xf32>
    %c0_2 = arith.constant 0 : index
    %c0_3 = arith.constant 0 : index
    %c0_4 = arith.constant 0 : index
    %1 = vector.load %arg3[%c0_2, %c0_3, %c0_4] : memref<1x4x1xf32, #tpu.memory_space<vmem>>, vector<1x4x1xf32>
    %2 = arith.mulf %0, %0 : vector<1x4x256xf32>
    %cst = arith.constant dense<0.000000e+00> : vector<1x256xf32>
    %3 = vector.multi_reduction <add>, %2, %cst [1] : vector<1x4x256xf32> to vector<1x256xf32>
    %4 = vector.shape_cast %3 : vector<1x256xf32> to vector<1x1x256xf32>
    %cst_5 = arith.constant 1.000000e-24 : f32
    %5 = vector.broadcast %cst_5 : f32 to vector<1x1x256xf32>
    %6 = arith.maximumf %4, %5 : vector<1x1x256xf32>
    %7 = math.rsqrt %6 : vector<1x1x256xf32>
    %8 = vector.broadcast %7 : vector<1x1x256xf32> to vector<1x4x256xf32>
    %9 = arith.mulf %0, %8 : vector<1x4x256xf32>
    %10 = vector.broadcast %1 : vector<1x4x1xf32> to vector<1x4x256xf32>
    %11 = arith.mulf %9, %10 : vector<1x4x256xf32>
    %c0_6 = arith.constant 0 : index
    %c0_7 = arith.constant 0 : index
    %c0_8 = arith.constant 0 : index
    %12 = vector.load %arg4[%c0_6, %c0_7, %c0_8] : memref<1x4x256xf32, #tpu.memory_space<vmem>>, vector<1x4x256xf32>
    tpu.vector_store %arg4[%c0_6, %c0_7, %c0_8], %11 {strides = array<i32>} : memref<1x4x256xf32, #tpu.memory_space<vmem>>, vector<1x4x256xf32>,
    return
  }
  func.func @transform_0(%arg0: i32, %arg1: i32) -> (i32, i32, i32) {
    %c0_i32 = arith.constant 0 : i32
    %c0_i32_0 = arith.constant 0 : i32
    return %arg0, %c0_i32, %arg1 : i32, i32, i32
  }
  func.func @transform_1(%arg0: i32, %arg1: i32) -> (i32, i32, i32) {
    %c0_i32 = arith.constant 0 : i32
    %c0_i32_0 = arith.constant 0 : i32
    %c0_i32_1 = arith.constant 0 : i32
    %c0_i32_2 = arith.constant 0 : i32
    return %c0_i32, %c0_i32_0, %c0_i32_1 : i32, i32, i32
  }
  func.func @transform_2(%arg0: i32, %arg1: i32) -> (i32, i32, i32) {
    %c0_i32 = arith.constant 0 : i32
    %c0_i32_0 = arith.constant 0 : i32
    return %arg0, %c0_i32, %arg1 : i32, i32, i32
  }
}

</mosaic_0001>

<bundles_post_ra>
// kernel: tpu_custom_call.1
= control target key start
LH: loop header
LB: loop body
LE: loop exit
PB: predicated region body
PF: predicated region fallthrough
CT: control target
= control target key end

     0   :  { %7 = vsyncpa [#allocation3], 0  ;;  %s681_s0 = inlined_call_operand.hbm [shape: f32[2,4,256], index: 0, kind: input, shape index: {}]   ;;  %s682_s1 = inlined_call_operand.vmem [shape: f32[1,4,1], index: 1, kind: input, shape index: {}]   ;;  %s683_s2 = inlined_call_operand.hbm [shape: f32[2,4,256], index: 2, kind: output, shape index: {}]  }
   0x1   :  { %9 = vsyncpa [#allocation3 + $0x1], 0 }
   0x2   :  { %10 = vsyncpa [#allocation4], 0 }
   0x3   :  { %12 = vsyncpa [#allocation4 + $0x1], 0  ;;  %s540_s9 = smov 0   ;;  %s542_s10 = smov 0  }
   0x4   :  { %s544_s11 = smov 0   ;;  %s546_s12 = smov 0  }
   0x5   :  { %s548_s13 = smov 0   ;;  %s550_s14 = smov 0  }
   0x6 LB: > { %s325_s15 = sadd.s32 4294967295, %s519_s14   ;;  %s326_s16 = sadd.s32 4294967294, %s519_s14   ;;  %s519_s14 = sphi %s550_s14, %s18_s14   ;;  %s515_s13 = sphi %s548_s13, %s695_s13   ;;  %s511_s12 = sphi %s546_s12, %s694_s12   ;;  %s507_s11 = sphi %s544_s11, %s693_s11   ;;  %s503_s10 = sphi %s542_s10, %s692_s10   ;;  %s499_s9 = sphi %s540_s9, %s691_s9  }
   0x7   : > { %s30_s17 = sadd.s32 1, %s515_s13  ;;  %s39_s18 = sadd.s32 1, %s507_s11 }
   0x8   : > { %p32_p0 = scmp.ge.s32.totalorder %s30_s17, 2  ;;  %p46_p1 = scmp.ne.s32.totalorder %s507_s11, %s503_s10 }
   0x9   : > { %p47_p2 = scmp.eq.s32.totalorder %s519_s14, 0  ;;  %p52_p3 = scmp.ne.s32.totalorder %s503_s10, %s499_s9 }
   0xa   : > { %s697_s17 = smov (%p32_p0, %s30_s17), 0  ;;  %p53_p5 = scmp.eq.s32.totalorder %s325_s15, 0 }
   0xb   : > { %p581_p4 = por %p47_p2, %p46_p1  ;;  %s34_s20 = ssub.s32 %s515_s13, %s697_s17 }
   0xc   : > { %p99_p6 = scmp.eq.s32.totalorder %s325_s15, 1  ;;  %p37_p7 = scmp.eq.s32.totalorder %s34_s20, 0 }
   0xd   : > { %p587_p8 = por %p53_p5, %p52_p3  ;;  %p105_p10 = scmp.eq.s32.totalorder %s326_s16, 1 }
   0xe   : > { %p591_p9 = por %p99_p6, %p46_p1  ;;  %p354_p13 = scmp.lt.s32.totalorder %s519_s14, 2 }
   0xf   : > { %s596_s23 = scalar_select %p37_p7, %s507_s11, %s39_s18  }
  0x10   : > { %p598_p11 = por %p105_p10, %p52_p3  ;;  %s128_s25 = sand.u32 1, %s507_s11  }
  0x11   : > { %s329_s26 = sshll.u32 %s128_s25, 3  ;;  %s340_s27 = sshll.u32 %s515_s13, 7 }
  0x12   : > { %s687_s24 = scalar_select %p598_p11, 1, 0 }
  0x13   : > { %s140_s30 = scalar_lea.hbm %s681_s0, %s340_s27  ;;  %s132_s3 = scalar_lea.vmem [#allocation2], %s329_s26 }
  0x14   : > { %s142_s4 = sshll.u32 %s132_s3, 4  ;;  %p611_p0 = pnand %p354_p13, %p581_p4  ;;  %s143_s4 = int_to_ptr.vmem [resolvable:$true] %s142_s4 }
  0x15   : > { %p332_p1 = scmp.ge.s32.totalorder %s519_s14, 1  ;;  %p147_p2 = scmp.lt.s32.totalorder %s519_s14, 3 }
  0x16   : > { %s129_s6 = scalar_lea.sflag [#allocation3], %s128_s25  ;;  %p413_p3 = pneg %p611_p0 }
  0x17   : > { %s424_s7 = scalar_lea.vmem %s143_s4, 128  ;;  %s521_s8 = smov [#allocation2]  }
  0x18   : > { %p425_p5 = scmp.ne.s32.totalorder %s143_s4, %s424_s7  ;;  %s429_s15 = sshll.u32 %s521_s8, 4  ;;  %s430_s15 = int_to_ptr.vmem [resolvable:$false] %s429_s15 }
  0x19   : > { %s431_s16 = scalar_lea.vmem %s430_s15, 256  ;;  %p432_p10 = scmp.lt.s32.totalorder %s143_s4, %s430_s15 }
  0x1a   : > { %p427_p6 = pnand %p425_p5, %p413_p3  ;;  %p433_p12 = scmp.lt.s32.totalorder %s431_s16, %s424_s7 }
  0x1c   : > { %p428_p7 = pneg %p427_p6  ;;  %p434_p4 = por %p433_p12, %p432_p10 }
  0x1e   : > { %p435_p13 = pnand %p434_p4, %p428_p7 }
  0x20   : > { %438 = shalt.err (!%p435_p13)
}
  0x21   : > { %349 = dma.hbm_to_vmem [thread:$0]  (!%p611_p0), %s140_s30, 128, %s143_s4, %s129_s6  }
  0x22   : > { %p148_p11 = pnand %p332_p1, %p147_p2 }
  0x23   : > { %s626_s18 = sand.u32 (!%p148_p11), 1, %s503_s10  }
  0x24   : > { %151 = sbr.rel (%p148_p11) target bundleno = 185 (0xb9), region = 28  ;;  %s333_s19 = sshll.u32 (!%p148_p11), %s626_s18, 3 }
  0x25   : > { %s154_s20 = scalar_lea.sflag (!%p148_p11), [#allocation3], %s626_s18  ;;  %s157_s25 = scalar_lea.vmem (!%p148_p11), [#allocation2], %s333_s19 }
  0x29   : > { %490 = dma.done.wait (%p587_p8), %s154_s20, 128  }
  0x2a   : > { %492 = vsyncadd (%p587_p8), %s154_s20, 4294967168  ;;  %v522_v0 = vmov 0   ;;  %v181_v1 = vld [vmem:[%s682_s1] sm:$0xf]  ;;  %vm186_vm0 = vcmask 1043456   ;;  %v217_v23 = vlaneseq  ;;  %s341_s21 = sshll.u32 %s511_s12, 7 }
  0x2b   : > { %406 = vset.pattern.permute.xlu0 %v522_v0  ;;  %v180_v2 = vld [vmem:[%s157_s25] sm:$0xff]  ;;  %v523_v21 = vmov 839922192   ;;  %s177_s28 = scalar_lea.vmem [#allocation5], %s333_s19  ;;  %s239_s4 = scalar_lea.hbm %s683_s2, %s341_s21 }
  0x2c   : > { %212 = vperm.xlu0 %406, %v181_v1   ;;  %v182_v3 = vmul.f32 %v180_v2, %v180_v2  ;;  %v215_v22 = vunpack.c.l.s4 %v523_v21  ;;  %v218_v27 = vshrl.u32 %v217_v23, 7  ;;  %s241_s29 = sshll.u32 %s177_s28, 4  ;;  %s225_s5 = scalar_lea.sflag [#allocation4], %s626_s18  ;;  %s242_s29 = int_to_ptr.vmem [resolvable:$true] %s241_s29 }
  0x2d   : > { %s439_s6 = scalar_lea.vmem %s242_s29, 128  ;;  %s524_s7 = smov [#allocation5]  }
  0x2e   : > { %v184_v4 = vcombine.high %v182_v3, %v182_v3  ;;  %v187_v5 = vsel %vm186_vm0, %v182_v3, 0.0  ;;  %v216_v26 = vunpack.c.0.s8 %v215_v22  ;;  %p440_p8 = scmp.ne.s32.totalorder %s242_s29, %s439_s6  ;;  %s443_s8 = sshll.u32 %s524_s7, 4  ;;  %s444_s8 = int_to_ptr.vmem [resolvable:$false] %s443_s8 }
  0x2f   : > { %v188_v7 = vrot.slane %v187_v5, 4  ;;  %s445_s12 = scalar_lea.vmem %s444_s8, 256  ;;  %p446_p0 = scmp.lt.s32.totalorder %s242_s29, %s444_s8 }
  0x30   : > { %v194_v6 = vsel %vm186_vm0, %v184_v4, 0.0  ;;  %v219_v29 = vsub.s32 %v216_v26, %v218_v27  ;;  %p441_p11 = pnand %p440_p8, %p591_p9  ;;  %p447_p1 = scmp.lt.s32.totalorder %s445_s12, %s439_s6 }
  0x31   : > { %v195_v8 = vrot.slane %v194_v6, 4  ;;  %v189_v9 = vadd.f32 %v188_v7, %v187_v5 }
  0x32   : > { %p442_p12 = pneg %p441_p11  ;;  %p448_p2 = por %p447_p1, %p446_p0 }
  0x33   : > { %v196_v10 = vadd.f32 %v195_v8, %v194_v6  ;;  %v190_v11 = vrot.slane %v189_v9, 2 }
  0x34   : > { %p449_p3 = pnand %p448_p2, %p442_p12 }
  0x35   : > { %v197_v12 = vrot.slane %v196_v10, 2  ;;  %v191_v13 = vadd.f32 %v190_v11, %v189_v9 }
  0x37   : > { %v198_v14 = vadd.f32 %v197_v12, %v196_v10  ;;  %v192_v15 = vrot.slane %v191_v13, 1 }
  0x39   : > { %v199_v16 = vrot.slane %v198_v14, 1  ;;  %v193_v17 = vadd.f32 %v192_v15, %v191_v13 }
  0x3b   : > { %v200_v18 = vadd.f32 %v199_v16, %v198_v14  ;;  %v201_v19 = vmax.f32 %v193_v17, 1e-24 }
  0x3d   : > { %v202_v20 = vmax.f32 %v200_v18, 1e-24  ;;  %407 = vrsqrt.f32 %v201_v19 }
  0x3f   : > { %409 = vrsqrt.f32 %v202_v20 }
  0x4a   : > { %v408_v24 = vpop.eup %407 }
  0x4c   : > { %v410_v25 = vpop.eup %409 }
  0x4d   : > { %v207_v28 = vcombine.low %v408_v24, %v410_v25 }
  0x4f   : > { %v209_v30 = vmul.f32 %v207_v28, %v180_v2 }
  0xa7   : > { %v213_v31 = vpop.permute.xlu0 %212 }
  0xa8   : > { %v220_v32 = vrot.slane %v213_v31, %v219_v29 }
  0xaa   : > { %v222_v33 = vmul.f32 %v220_v32, %v209_v30 }
  0xac   : > { %223 = vst [vmem:[%s177_s28] sm:$0xff] %v222_v33 }
  0xad   : > { %452 = shalt.err (!%p449_p3)
}
  0xae   : > { %s453_s15 = scalar_lea.hbm %s239_s4, 128  ;;  %s457_s19 = scalar_lea.hbm %s683_s2, 256 }
  0xaf   : > { %p454_p5 = scmp.ne.s32.totalorder %s239_s4, %s453_s15  ;;  %p458_p10 = scmp.lt.s32.totalorder %s239_s4, %s683_s2 }
  0xb0   : > { %p459_p4 = scmp.lt.s32.totalorder %s457_s19, %s453_s15 }
  0xb1   : > { %p455_p6 = pnand %p454_p5, %p591_p9 }
  0xb2   : > { %p460_p13 = por %p459_p4, %p458_p10 }
  0xb3   : > { %p456_p7 = pneg %p455_p6 }
  0xb5   : > { %p461_p8 = pnand %p460_p13, %p456_p7 }
  0xb7   : > { %464 = shalt.err (!%p461_p8)
}
  0xb8   : > { %344 = dma.vmem_to_hbm [thread:$0]  (%p591_p9), %s242_s29, 128, %s239_s4, %s225_s5  }
  0xb9 PF: > { %s253_s26 = sand.u32 1, %s499_s9   ;;  %p689_p11 = scmp.ne.s32.totalorder %s687_s24, 0 }
  0xba   : > { %p690_p12 = scmp.ge.s32.totalorder %s519_s14, 2  ;;  %s254_s27 = scalar_lea.sflag [#allocation4], %s253_s26 }
  0xbc   : > { %p351_p0 = pnand %p690_p12, %p689_p11 }
  0xbe   : > { %p352_p1 = pneg %p351_p0 }
  0xc0   : > { %494 = dma.done.wait (%p352_p1), %s254_s27, 128  }
  0xc1   : > { %496 = vsyncadd (%p352_p1), %s254_s27, 4294967168  ;;  %s18_s14 = sadd.s32 1, %s519_s14   ;;  %s691_s9 = smov %s503_s10 }
  0xc2   : > { %p15_p2 = scmp.ge.s32.totalorder %s18_s14, 4   ;;  %s692_s10 = smov %s507_s11 }
  0xc3   : > { %s693_s11 = smov %s596_s23  ;;  %s694_s12 = smov %s515_s13 }
  0xc4   : > { %s695_s13 = smov %s697_s17  ;;  %17 = sbr.rel (!%p15_p2) target bundleno = 6 (0x6), region = 73 }
  0xc9   :  { %259 = vsyncpa [#allocation3], 1 }
  0xca   :  { %261 = vsyncpa [#allocation3 + $0x1], 1 }
  0xcb   :  { %262 = vsyncpa [#allocation4], 1 }
  0xcc   :  { %264 = vsyncpa [#allocation4 + $0x1], 1 }

</bundles_post_ra>
